<compile_context>
chip_gen: v7x
topology: tpu7x:2x2x1
jax: 0.10.0
libtpu: 0.0.40
codegen_flags: <defaults>
</compile_context>

<pallas_src>
import jax
import jax.numpy as jnp
from jax import lax
from jax.experimental import pallas as pl
from jax.experimental.pallas import tpu as pltpu


def mals_kernel(ws_ref, w1_ref, b1_ref, w2_ref, b2_ref, out_ref, packed_ref):
    Bb, T, C = ws_ref.shape
    M = Bb * T

    # Boundary-row masks: t == 0 / t == T-1 within each batch row of the slab.
    t_idx = lax.broadcasted_iota(jnp.int32, (Bb, T, C), 1).reshape(M, C)
    is_first = t_idx == 0
    is_last = t_idx == (T - 1)

    def shifted(h):
        # h[t-1] / h[t+1] along time (wraps; boundary rows fixed by the caller).
        rp = pltpu.roll(h, 1, axis=0)        # row i <- h[i-1]
        rn = pltpu.roll(h, M - 1, axis=0)    # row i <- h[i+1]
        return rp, rn

    def conv3_reflect(h, w_ref, b_ref):
        """Conv1d(k=3, s=1, reflect pad=1) on the flattened (M, C) slab."""
        rp, rn = shifted(h)
        # Reflect pad: at t==0 use h[1] (== rn row), at t==T-1 use h[T-2]
        # (== rp row).  The same selects also repair roll wrap-around rows.
        packed_ref[:, 0:C]         = jnp.where(is_first, rn, rp)   # h[t-1]
        packed_ref[:, C:2 * C]     = h                             # h[t]
        packed_ref[:, 2 * C:3 * C] = jnp.where(is_last, rp, rn)    # h[t+1]
        y = jnp.dot(packed_ref[...].astype(w_ref.dtype), w_ref[...],
                    preferred_element_type=jnp.float32)
        return y + b_ref[...]

    x = ws_ref[...].reshape(M, C).astype(jnp.float32)

    # --- moving average, replicate padding (f32, VPU) ---
    rp, rn = shifted(x)
    x_prev = jnp.where(is_first, x, rp)   # replicate: x[-1] := x[0]
    x_next = jnp.where(is_last, x, rn)    # replicate: x[T] := x[T-1]
    ma = 0.25 * x_prev + 0.5 * x + 0.25 * x_next

    # --- conv1 (reflect) + LeakyReLU(0.1) ---
    h1 = conv3_reflect(ma, w1_ref, b1_ref)
    h1 = jnp.maximum(h1, 0.1 * h1)

    # --- conv2 (reflect) ---
    h2 = conv3_reflect(h1, w2_ref, b2_ref)

    out_ref[...] = h2.reshape(Bb, T, C).astype(out_ref.dtype)


def _pick_batch_block(B, T, C, vmem_budget_bytes=8 << 20):
    """Pick how many batch rows to process per grid step."""
    # ~12 live (T, C)-sized f32 temporaries per batch row inside the kernel;
    # stay well inside the scoped VMEM limit (note v7x has only 64 MiB
    # physical / 32 MiB default scoped VMEM vs 128 MiB on v5e/v6e).
    per_row = T * C * 4 * 12
    cap = max(1, min(16, vmem_budget_bytes // max(per_row, 1)))
    bb = min(B, cap)
    while B % bb:
        bb -= 1
    # Expose at least 2 grid steps so both TensorCores on 2-TC chips get work.
    if B > 1 and bb == B:
        bb = max(d for d in range(1, bb) if B % d == 0)
    return bb


def mals_forward(ws, w1, b1, w2, b2, *, matmul_dtype=jnp.bfloat16):
    """MaLS forward.

    ws     : (B, T, C) float32 latent sequence (T >= 2 for reflect padding)
    w1, w2 : torch-layout Conv1d weights, shape (C_out, C_in, 3)
    b1, b2 : (C,) biases
    """
    B, T, C = ws.shape
    assert T >= 2, "reflect padding requires T >= 2"

    # Pack the 3 taps along the contraction dim:
    #   w_packed[k*C + ci, co] = w[co, ci, k]   ->  (3C, C), matmul K = 3C.
    def pack_w(w):
        return jnp.transpose(w, (2, 1, 0)).reshape(3 * C, C).astype(matmul_dtype)

    w1k, w2k = pack_w(w1), pack_w(w2)
    b1r = b1.reshape(1, C).astype(jnp.float32)
    b2r = b2.reshape(1, C).astype(jnp.float32)

    bb = _pick_batch_block(B, T, C)
    grid = (B // bb,)

    # TODO(synk): for very long T, add a T grid axis with a ±3-row halo instead
    # of loading the full (T, C) slab per batch block.
    return pl.pallas_call(
        mals_kernel,
        out_shape=jax.ShapeDtypeStruct((B, T, C), ws.dtype),
        grid_spec=pltpu.PrefetchScalarGridSpec(
            num_scalar_prefetch=0,
            grid=grid,
            in_specs=[
                pl.BlockSpec((bb, T, C), lambda i: (i, 0, 0)),
                pl.BlockSpec((3 * C, C), lambda i: (0, 0)),
                pl.BlockSpec((1, C), lambda i: (0, 0)),
                pl.BlockSpec((3 * C, C), lambda i: (0, 0)),
                pl.BlockSpec((1, C), lambda i: (0, 0)),
            ],
            out_specs=pl.BlockSpec((bb, T, C), lambda i: (i, 0, 0)),
            scratch_shapes=[pltpu.VMEM((bb * T, 3 * C), jnp.float32)],
        ),
        compiler_params=pltpu.CompilerParams(
            dimension_semantics=("parallel",)),
    )(ws, w1k, b1r, w2k, b2r)


def mals_reference(ws, w1, b1, w2, b2):
    """Pure-JAX f32 reference mirroring the PyTorch forward (for validation)."""
    # moving average with replicate padding along time
    x = jnp.concatenate([ws[:, 0:1], ws, ws[:, -1:]], axis=1)
    ma = (0.5 * x[:, 2:] + x[:, 1:-1] + 0.5 * x[:, :-2]) / 2.0

    def conv1d_reflect(h, w, b):  # h: (B, T, C), w: (Co, Ci, 3), b: (Co,)
        h_prev = jnp.concatenate([h[:, 1:2], h[:, :-1]], axis=1)
        h_next = jnp.concatenate([h[:, 1:], h[:, -2:-1]], axis=1)
        y = (jnp.einsum("btc,oc->bto", h_prev, w[:, :, 0])
             + jnp.einsum("btc,oc->bto", h,      w[:, :, 1])
             + jnp.einsum("btc,oc->bto", h_next, w[:, :, 2]))
        return y + b[None, None, :]

    h1 = conv1d_reflect(ma, w1, b1)
    h1 = jnp.where(h1 > 0, h1, 0.1 * h1)
    return conv1d_reflect(h1, w2, b2)


if __name__ == "__main__":
    B, T, C = 4, 8, 32  # batch, sequence length, dim_w

    key = jax.random.PRNGKey(0)
    k_ws, k_w1, k_b1, k_w2, k_b2 = jax.random.split(key, 5)

    ws = jax.random.normal(k_ws, (B, T, C), dtype=jnp.float32)
    # Deterministic synthetic Conv1d parameters (torch layout: (C_out, C_in, 3))
    scale = 1.0 / (3.0 * C) ** 0.5
    w1 = jax.random.uniform(k_w1, (C, C, 3), jnp.float32, -scale, scale)
    b1 = jax.random.uniform(k_b1, (C,), jnp.float32, -scale, scale)
    w2 = jax.random.uniform(k_w2, (C, C, 3), jnp.float32, -scale, scale)
    b2 = jax.random.uniform(k_b2, (C,), jnp.float32, -scale, scale)

    out = jax.block_until_ready(mals_forward(ws, w1, b1, w2, b2))
    ref = jax.block_until_ready(mals_reference(ws, w1, b1, w2, b2))

    assert out.shape == (B, T, C)
    max_err = float(jnp.max(jnp.abs(out - ref)))
    # bf16 MXU operands with f32 accumulation -> loosened tolerance vs f32 ref.
    assert jnp.allclose(out, ref, atol=3e-2, rtol=3e-2), (
        f"mismatch vs reference (max abs err {max_err:.3e})")

    print("KERNEL_OK")
</pallas_src>

<mosaic_0001>
module attributes {stable_mosaic.version = 11 : i64} {
  func.func @mals_kernel(%arg0: i32, %arg1: memref<2x8x32xf32, #tpu.memory_space<vmem>>, %arg2: memref<96x32xbf16, #tpu.memory_space<vmem>>, %arg3: memref<1x32xf32, #tpu.memory_space<vmem>>, %arg4: memref<96x32xbf16, #tpu.memory_space<vmem>>, %arg5: memref<1x32xf32, #tpu.memory_space<vmem>>, %arg6: memref<2x8x32xf32, #tpu.memory_space<vmem>>, %arg7: memref<16x96xf32, #tpu.memory_space<vmem>>) attributes {dimension_semantics = [#tpu.dimension_semantics<parallel>], iteration_bounds = array<i64: 2>, scalar_prefetch = 0 : i64, scratch_operands = 1 : i64, tpu.core_type = #tpu.core_type<tc>, window_params = [{transform_indices = @transform_0, window_bounds = array<i64: 2, 8, 32>}, {pipeline_mode = #tpu.pipeline_mode<synchronous>, transform_indices = @transform_1, window_bounds = array<i64: 96, 32>}, {pipeline_mode = #tpu.pipeline_mode<synchronous>, transform_indices = @transform_2, window_bounds = array<i64: 1, 32>}, {pipeline_mode = #tpu.pipeline_mode<synchronous>, transform_indices = @transform_3, window_bounds = array<i64: 96, 32>}, {pipeline_mode = #tpu.pipeline_mode<synchronous>, transform_indices = @transform_4, window_bounds = array<i64: 1, 32>}, {transform_indices = @transform_5, window_bounds = array<i64: 2, 8, 32>}]} {
    %0 = tpu.iota {dimensions = array<i32: 1>} : vector<2x8x32xi32>
    %1 = vector.shape_cast %0 : vector<2x8x32xi32> to vector<16x32xi32>
    %c0_i32 = arith.constant 0 : i32
    %2 = vector.broadcast %c0_i32 : i32 to vector<16x32xi32>
    %3 = arith.cmpi eq, %1, %2 : vector<16x32xi32>
    %c7_i32 = arith.constant 7 : i32
    %4 = vector.broadcast %c7_i32 : i32 to vector<16x32xi32>
    %5 = arith.cmpi eq, %1, %4 : vector<16x32xi32>
    %c0 = arith.constant 0 : index
    %c0_0 = arith.constant 0 : index
    %c0_1 = arith.constant 0 : index
    %6 = vector.load %arg1[%c0, %c0_0, %c0_1] : memref<2x8x32xf32, #tpu.memory_space<vmem>>, vector<2x8x32xf32>
    %7 = vector.shape_cast %6 : vector<2x8x32xf32> to vector<16x32xf32>
    %c1_i32 = arith.constant 1 : i32
    %8 = tpu.dynamic_rotate %7 by %c1_i32 dim 0 : vector<16x32xf32>, i32 -> vector<16x32xf32>
    %c15_i32 = arith.constant 15 : i32
    %9 = tpu.dynamic_rotate %7 by %c15_i32 dim 0 : vector<16x32xf32>, i32 -> vector<16x32xf32>
    %10 = arith.select %3, %7, %8 : vector<16x32xi1>, vector<16x32xf32>
    %11 = arith.select %5, %7, %9 : vector<16x32xi1>, vector<16x32xf32>
    %cst = arith.constant 2.500000e-01 : f32
    %12 = vector.broadcast %cst : f32 to vector<16x32xf32>
    %13 = arith.mulf %12, %10 : vector<16x32xf32>
    %cst_2 = arith.constant 5.000000e-01 : f32
    %14 = vector.broadcast %cst_2 : f32 to vector<16x32xf32>
    %15 = arith.mulf %14, %7 : vector<16x32xf32>
    %16 = arith.addf %13, %15 : vector<16x32xf32>
    %cst_3 = arith.constant 2.500000e-01 : f32
    %17 = vector.broadcast %cst_3 : f32 to vector<16x32xf32>
    %18 = arith.mulf %17, %11 : vector<16x32xf32>
    %19 = arith.addf %16, %18 : vector<16x32xf32>
    %c1_i32_4 = arith.constant 1 : i32
    %20 = tpu.dynamic_rotate %19 by %c1_i32_4 dim 0 : vector<16x32xf32>, i32 -> vector<16x32xf32>
    %c15_i32_5 = arith.constant 15 : i32
    %21 = tpu.dynamic_rotate %19 by %c15_i32_5 dim 0 : vector<16x32xf32>, i32 -> vector<16x32xf32>
    %22 = arith.select %3, %21, %20 : vector<16x32xi1>, vector<16x32xf32>
    %c0_6 = arith.constant 0 : index
    %c0_7 = arith.constant 0 : index
    %23 = vector.load %arg7[%c0_6, %c0_7] : memref<16x96xf32, #tpu.memory_space<vmem>>, vector<16x32xf32>
    tpu.vector_store %arg7[%c0_6, %c0_7], %22 {strides = array<i32>} : memref<16x96xf32, #tpu.memory_space<vmem>>, vector<16x32xf32>,
    %c0_8 = arith.constant 0 : index
    %c32 = arith.constant 32 : index
    %24 = vector.load %arg7[%c0_8, %c32] : memref<16x96xf32, #tpu.memory_space<vmem>>, vector<16x32xf32>
    tpu.vector_store %arg7[%c0_8, %c32], %19 {strides = array<i32>} : memref<16x96xf32, #tpu.memory_space<vmem>>, vector<16x32xf32>,
    %25 = arith.select %5, %20, %21 : vector<16x32xi1>, vector<16x32xf32>
    %c0_9 = arith.constant 0 : index
    %c64 = arith.constant 64 : index
    %26 = vector.load %arg7[%c0_9, %c64] : memref<16x96xf32, #tpu.memory_space<vmem>>, vector<16x32xf32>
    tpu.vector_store %arg7[%c0_9, %c64], %25 {strides = array<i32>} : memref<16x96xf32, #tpu.memory_space<vmem>>, vector<16x32xf32>,
    %c0_10 = arith.constant 0 : index
    %c0_11 = arith.constant 0 : index
    %27 = vector.load %arg7[%c0_10, %c0_11] : memref<16x96xf32, #tpu.memory_space<vmem>>, vector<16x96xf32>
    %28 = arith.truncf %27 : vector<16x96xf32> to vector<16x96xbf16>
    %c0_12 = arith.constant 0 : index
    %c0_13 = arith.constant 0 : index
    %29 = vector.load %arg2[%c0_12, %c0_13] : memref<96x32xbf16, #tpu.memory_space<vmem>>, vector<96x32xbf16>
    %cst_14 = arith.constant dense<0.000000e+00> : vector<16x32xf32>
    %30 = tpu.matmul %28, %29, %cst_14 {dimension_numbers = #tpu.dot_dimension_numbers<[1], [0], [0], [1], [0, 0, 1, 1], [], []>} : vector<16x96xbf16>, vector<96x32xbf16>, vector<16x32xf32> -> vector<16x32xf32>
    %c0_15 = arith.constant 0 : index
    %c0_16 = arith.constant 0 : index
    %31 = vector.load %arg3[%c0_15, %c0_16] : memref<1x32xf32, #tpu.memory_space<vmem>>, vector<1x32xf32>
    %32 = vector.broadcast %31 : vector<1x32xf32> to vector<16x32xf32>
    %33 = arith.addf %30, %32 : vector<16x32xf32>
    %cst_17 = arith.constant 1.000000e-01 : f32
    %34 = vector.broadcast %cst_17 : f32 to vector<16x32xf32>
    %35 = arith.mulf %34, %33 : vector<16x32xf32>
    %36 = arith.maximumf %33, %35 : vector<16x32xf32>
    %c1_i32_18 = arith.constant 1 : i32
    %37 = tpu.dynamic_rotate %36 by %c1_i32_18 dim 0 : vector<16x32xf32>, i32 -> vector<16x32xf32>
    %c15_i32_19 = arith.constant 15 : i32
    %38 = tpu.dynamic_rotate %36 by %c15_i32_19 dim 0 : vector<16x32xf32>, i32 -> vector<16x32xf32>
    %39 = arith.select %3, %38, %37 : vector<16x32xi1>, vector<16x32xf32>
    %c0_20 = arith.constant 0 : index
    %c0_21 = arith.constant 0 : index
    %40 = vector.load %arg7[%c0_20, %c0_21] : memref<16x96xf32, #tpu.memory_space<vmem>>, vector<16x32xf32>
    tpu.vector_store %arg7[%c0_20, %c0_21], %39 {strides = array<i32>} : memref<16x96xf32, #tpu.memory_space<vmem>>, vector<16x32xf32>,
    %c0_22 = arith.constant 0 : index
    %c32_23 = arith.constant 32 : index
    %41 = vector.load %arg7[%c0_22, %c32_23] : memref<16x96xf32, #tpu.memory_space<vmem>>, vector<16x32xf32>
    tpu.vector_store %arg7[%c0_22, %c32_23], %36 {strides = array<i32>} : memref<16x96xf32, #tpu.memory_space<vmem>>, vector<16x32xf32>,
    %42 = arith.select %5, %37, %38 : vector<16x32xi1>, vector<16x32xf32>
    %c0_24 = arith.constant 0 : index
    %c64_25 = arith.constant 64 : index
    %43 = vector.load %arg7[%c0_24, %c64_25] : memref<16x96xf32, #tpu.memory_space<vmem>>, vector<16x32xf32>
    tpu.vector_store %arg7[%c0_24, %c64_25], %42 {strides = array<i32>} : memref<16x96xf32, #tpu.memory_space<vmem>>, vector<16x32xf32>,
    %c0_26 = arith.constant 0 : index
    %c0_27 = arith.constant 0 : index
    %44 = vector.load %arg7[%c0_26, %c0_27] : memref<16x96xf32, #tpu.memory_space<vmem>>, vector<16x96xf32>
    %45 = arith.truncf %44 : vector<16x96xf32> to vector<16x96xbf16>
    %c0_28 = arith.constant 0 : index
    %c0_29 = arith.constant 0 : index
    %46 = vector.load %arg4[%c0_28, %c0_29] : memref<96x32xbf16, #tpu.memory_space<vmem>>, vector<96x32xbf16>
    %cst_30 = arith.constant dense<0.000000e+00> : vector<16x32xf32>
    %47 = tpu.matmul %45, %46, %cst_30 {dimension_numbers = #tpu.dot_dimension_numbers<[1], [0], [0], [1], [0, 0, 1, 1], [], []>} : vector<16x96xbf16>, vector<96x32xbf16>, vector<16x32xf32> -> vector<16x32xf32>
    %c0_31 = arith.constant 0 : index
    %c0_32 = arith.constant 0 : index
    %48 = vector.load %arg5[%c0_31, %c0_32] : memref<1x32xf32, #tpu.memory_space<vmem>>, vector<1x32xf32>
    %49 = vector.broadcast %48 : vector<1x32xf32> to vector<16x32xf32>
    %50 = arith.addf %47, %49 : vector<16x32xf32>
    %51 = vector.shape_cast %50 : vector<16x32xf32> to vector<2x8x32xf32>
    %c0_33 = arith.constant 0 : index
    %c0_34 = arith.constant 0 : index
    %c0_35 = arith.constant 0 : index
    %52 = vector.load %arg6[%c0_33, %c0_34, %c0_35] : memref<2x8x32xf32, #tpu.memory_space<vmem>>, vector<2x8x32xf32>
    tpu.vector_store %arg6[%c0_33, %c0_34, %c0_35], %51 {strides = array<i32>} : memref<2x8x32xf32, #tpu.memory_space<vmem>>, vector<2x8x32xf32>,
    return
  }
  func.func @transform_0(%arg0: i32) -> (i32, i32, i32) {
    %c0_i32 = arith.constant 0 : i32
    %c0_i32_0 = arith.constant 0 : i32
    %c0_i32_1 = arith.constant 0 : i32
    return %arg0, %c0_i32, %c0_i32_0 : i32, i32, i32
  }
  func.func @transform_1(%arg0: i32) -> (i32, i32) {
    %c0_i32 = arith.constant 0 : i32
    %c0_i32_0 = arith.constant 0 : i32
    %c0_i32_1 = arith.constant 0 : i32
    return %c0_i32, %c0_i32_0 : i32, i32
  }
  func.func @transform_2(%arg0: i32) -> (i32, i32) {
    %c0_i32 = arith.constant 0 : i32
    %c0_i32_0 = arith.constant 0 : i32
    %c0_i32_1 = arith.constant 0 : i32
    return %c0_i32, %c0_i32_0 : i32, i32
  }
  func.func @transform_3(%arg0: i32) -> (i32, i32) {
    %c0_i32 = arith.constant 0 : i32
    %c0_i32_0 = arith.constant 0 : i32
    %c0_i32_1 = arith.constant 0 : i32
    return %c0_i32, %c0_i32_0 : i32, i32
  }
  func.func @transform_4(%arg0: i32) -> (i32, i32) {
    %c0_i32 = arith.constant 0 : i32
    %c0_i32_0 = arith.constant 0 : i32
    %c0_i32_1 = arith.constant 0 : i32
    return %c0_i32, %c0_i32_0 : i32, i32
  }
  func.func @transform_5(%arg0: i32) -> (i32, i32, i32) {
    %c0_i32 = arith.constant 0 : i32
    %c0_i32_0 = arith.constant 0 : i32
    %c0_i32_1 = arith.constant 0 : i32
    return %arg0, %c0_i32, %c0_i32_0 : i32, i32, i32
  }
}

</mosaic_0001>

<bundles_post_ra>
// kernel: tpu_custom_call.1
= control target key start
LH: loop header
LB: loop body
LE: loop exit
PB: predicated region body
PF: predicated region fallthrough
CT: control target
= control target key end

     0   :  { %10 = vsyncpa [#allocation4], 0  ;;  %s1084_s0 = inlined_call_operand.vmem [shape: f32[4,8,32], index: 0, kind: input, shape index: {}]   ;;  %s1085_s1 = inlined_call_operand.vmem [shape: bf16[96,32], index: 1, kind: input, shape index: {}]   ;;  %s1086_s2 = inlined_call_operand.vmem [shape: f32[1,32], index: 2, kind: input, shape index: {}]   ;;  %s1087_s3 = inlined_call_operand.vmem [shape: bf16[96,32], index: 3, kind: input, shape index: {}]   ;;  %s1088_s4 = inlined_call_operand.vmem [shape: f32[1,32], index: 4, kind: input, shape index: {}]   ;;  %s1089_s5 = inlined_call_operand.hbm [shape: f32[4,8,32], index: 5, kind: output, shape index: {}]  }
   0x1   :  { %12 = vsyncpa [#allocation4 + $0x1], 0  ;;  %s848_s18 = smov 0   ;;  %s850_s19 = smov 0  }
   0x2   :  { %s852_s20 = smov 0   ;;  %s854_s21 = smov 0  }
   0x3 LB: > { %s869_s22 = sadd.s32 4294967295, %s809_s21   ;;  %s615_s23 = sadd.s32 4294967294, %s809_s21   ;;  %s809_s21 = sphi %s854_s21, %s1095_s21   ;;  %s805_s20 = sphi %s852_s20, %s1094_s20   ;;  %s801_s19 = sphi %s850_s19, %s1093_s19   ;;  %s797_s18 = sphi %s848_s18, %s1092_s18  }
   0x4   : > { %s873_s24 = sadd.s32 1, %s809_s21   ;;  %s135_s25 = sadd.s32 1, %s805_s20 }
   0x5   : > { %s132_s26 = ssub.s32 %s809_s21, %s873_s24  ;;  %p145_p0 = scmp.ne.s32.totalorder %s805_s20, %s801_s19 }
   0x6   : > { %p133_p1 = scmp.eq.s32.totalorder %s132_s26, 0  ;;  %p146_p2 = scmp.eq.s32.totalorder %s869_s22, 1 }
   0x7   : > { %p151_p3 = scmp.ne.s32.totalorder %s801_s19, %s797_s18  ;;  %p152_p4 = scmp.eq.s32.totalorder %s615_s23, 1 }
   0x8   : > { %s884_s27 = scalar_select %p133_p1, %s805_s20, %s135_s25  }
   0x9   : > { %p886_p5 = por %p146_p2, %p145_p0  ;;  %p890_p6 = por %p152_p4, %p151_p3 }
   0xa   : > { %p618_p7 = scmp.ge.s32.totalorder %s809_s21, 1  ;;  %p191_p8 = scmp.lt.s32.totalorder %s809_s21, 3 }
   0xc   : > { %p192_p9 = pnand %p618_p7, %p191_p8 }
   0xd   : > { %s620_s30 = sshll.u32 (!%p192_p9), %s869_s22, 1  ;;  %v227_v0 = vlaneseq (!%p192_p9)  ;;  %v735_v1 = vld [vmem:[%s1085_s1] sm:$0xff] (!%p192_p9)   ;;  %v811_v2 = vmov (!%p192_p9), 0.0   ;;  %v736_v4 = vld [vmem:[%s1085_s1 + $0x8] sm:$0xff] (!%p192_p9)   ;;  %v737_v5 = vld [vmem:[%s1085_s1 + $0x10] sm:$0xff] (!%p192_p9)   ;;  %vm812_vm4 = vmmov (!%p192_p9), 0  }
   0xe   : > { %195 = sbr.rel (%p192_p9) target bundleno = 748 (0x2ec), region = 40  ;;  %p220_p10 = scmp.lt.s32.totalorder (!%p192_p9), %s620_s30, 3  ;;  %658 = vmatprep.subr.bf16.mxu0 (!%p192_p9), %v811_v2  ;;  %674 = vmatprep.subr.bf16.mxu1 (!%p192_p9), %v811_v2  ;;  %v738_v14 = vld [vmem:[%s1085_s1 + $0x18] sm:$0xff] (!%p192_p9)   ;;  %v739_v29 = vld [vmem:[%s1085_s1 + $0x20] sm:$0xff] (!%p192_p9)   ;;  %vm267_vm5 = vcmask (!%p192_p9), 261120   ;;  %v740_v36 = vld [vmem:[%s1085_s1 + $0x28] sm:$0xff] (!%p192_p9)  }
   0xf   : > { %v902_v3 = vshrl.u32 (!%p192_p9), %v227_v0, 7  ;;  %659 = vmatpush3.bf16.msra.mxu0 (!%p192_p9), %v735_v1  ;;  %670 = vmatprep.mubr.msk.bf16.mxu0 (!%p192_p9), %vm812_vm4, %v811_v2  ;;  %s813_s26 = smov (!%p192_p9), 32   ;;  %s814_s7 = smov (!%p192_p9), 64   ;;  %vm278_vm6 = vcmask (!%p192_p9), 523520   ;;  %vm291_vm7 = vcmask (!%p192_p9), 785920   ;;  %vm352_vm8 = vcmask (!%p192_p9), 785408  }
  0x10   : > { %660 = vmatprep.subr.bf16.mxu0 (!%p192_p9), %v811_v2  ;;  %686 = vmatprep.mubr.msk.bf16.mxu1 (!%p192_p9), %vm812_vm4, %v811_v2  ;;  %v741_v52 = vld [vmem:[%s1087_s3] sm:$0xff] (!%p192_p9)   ;;  %v742_v53 = vld [vmem:[%s1087_s3 + $0x8] sm:$0xff] (!%p192_p9)   ;;  %v743_v54 = vld [vmem:[%s1087_s3 + $0x10] sm:$0xff] (!%p192_p9)   ;;  %s643_s12 = sshll.u32 (!%p192_p9), %s869_s22, 8  ;;  %s815_s17 = smov (!%p192_p9), [#allocation3]  }
  0x11   : > { %vm229_vm0 = vcmp.eq.s32.totalorder (!%p192_p9), %v902_v3, 0  ;;  %vm230_vm1 = vcmp.eq.s32.totalorder (!%p192_p9), %v902_v3, 7  ;;  %vm235_vm2 = vcmp.lt.s32.totalorder (!%p192_p9), %v902_v3, 1  ;;  %vm240_vm3 = vcmp.lt.s32.totalorder (!%p192_p9), %v902_v3, 7  ;;  %675 = vmatpush3.bf16.msra.mxu1 (!%p192_p9), %v741_v52  ;;  %v744_v55 = vld [vmem:[%s1087_s3 + $0x18] sm:$0xff] (!%p192_p9)   ;;  %v745_v58 = vld [vmem:[%s1087_s3 + $0x20] sm:$0xff] (!%p192_p9)  }
  0x12   : > { %676 = vmatprep.subr.bf16.mxu1 (!%p192_p9), %v811_v2  ;;  %v622_v56 = vld [vmem:[%s1086_s2] ss:$0 sm:$0xff] (!%p192_p9)  ;;  %v746_v1 = vld [vmem:[%s1087_s3 + $0x28] sm:$0xff] (!%p192_p9)   ;;  %s751_s23 = sshll.u32 (!%p192_p9), %s815_s17, 4  ;;  %s752_s23 = int_to_ptr.vmem [resolvable:$false] %s751_s23 }
  0x13   : > { %661 = vmatpush3.bf16.msra.mxu0 (!%p192_p9), %v736_v4  ;;  %s753_s25 = scalar_lea.vmem (!%p192_p9), %s752_s23, 512 }
  0x14   : > { %662 = vmatprep.subr.bf16.mxu0 (!%p192_p9), %v811_v2 }
  0x15   : > { %s1097_s30 = smov (!%p220_p10, %s620_s30), 3  ;;  %677 = vmatpush3.bf16.msra.mxu1 %v742_v53 }
  0x16   : > { %s621_s10 = sshll.u32 %s1097_s30, 3  ;;  %678 = vmatprep.subr.bf16.mxu1 %v811_v2 }
  0x17   : > { %s223_s15 = scalar_lea.vmem %s1084_s0, %s621_s10  ;;  %663 = vmatpush3.bf16.msra.mxu0 %v737_v5 }
  0x18   : > { %v231_v6 = vld [vmem:[%s223_s15] sm:$0xff]  ;;  %v232_v7 = vld [vmem:[%s223_s15 + $0x8] sm:$0xff]  ;;  %664 = vmatprep.subr.bf16.mxu0 %v811_v2  ;;  %s1039_s15 = scalar_lea.hbm %s1089_s5, %s643_s12 }
  0x19   : > { %v233_v8 = vrot.slane %v231_v6, 7  ;;  %v234_v9 = vrot.slane %v232_v7, 7  ;;  %v238_v10 = vrot.slane %v231_v6, 1  ;;  %v239_v11 = vrot.slane %v232_v7, 1  ;;  %679 = vmatpush3.bf16.msra.mxu1 %v743_v54 }
  0x1a   : > { %v249_v12 = vmul.f32 0.5, %v231_v6  ;;  %v250_v13 = vmul.f32 0.5, %v232_v7  ;;  %680 = vmatprep.subr.bf16.mxu1 %v811_v2 }
  0x1b   : > { %v237_v15 = vsel %vm235_vm2, %v234_v9, %v233_v8  ;;  %v241_v16 = vsel %vm240_vm3, %v238_v10, %v239_v11  ;;  %v236_v17 = vsel %vm235_vm2, %v233_v8, %v234_v9  ;;  %v242_v18 = vsel %vm240_vm3, %v239_v11, %v238_v10  ;;  %665 = vmatpush3.bf16.msra.mxu0 %v738_v14 }
  0x1c   : > { %v243_v19 = vsel %vm229_vm0, %v231_v6, %v237_v15  ;;  %v245_v20 = vsel %vm230_vm1, %v231_v6, %v241_v16  ;;  %v244_v21 = vsel %vm229_vm0, %v232_v7, %v236_v17  ;;  %v246_v22 = vsel %vm230_vm1, %v232_v7, %v242_v18  ;;  %666 = vmatprep.subr.bf16.mxu0 %v811_v2 }
  0x1d   : > { %v247_v23 = vmul.f32 0.25, %v243_v19  ;;  %v253_v24 = vmul.f32 0.25, %v245_v20  ;;  %v248_v25 = vmul.f32 0.25, %v244_v21  ;;  %v254_v26 = vmul.f32 0.25, %v246_v22  ;;  %681 = vmatpush3.bf16.msra.mxu1 %v744_v55 }
  0x1e   : > { %682 = vmatprep.subr.bf16.mxu1 %v811_v2 }
  0x1f   : > { %v251_v27 = vadd.f32 %v249_v12, %v247_v23  ;;  %v252_v28 = vadd.f32 %v250_v13, %v248_v25  ;;  %667 = vmatpush3.bf16.msra.mxu0 %v739_v29 }
  0x20   : > { %668 = vmatprep.subr.bf16.mxu0 %v811_v2 }
  0x21   : > { %v255_v30 = vadd.f32 %v253_v24, %v251_v27  ;;  %v256_v31 = vadd.f32 %v254_v26, %v252_v28  ;;  %683 = vmatpush3.bf16.msra.mxu1 %v745_v58  ;;  %v630_v24 = vld [vmem:[%s1088_s4] ss:$0 sm:$0xff] }
  0x22   : > { %684 = vmatprep.subr.bf16.mxu1 %v811_v2 }
  0x23   : > { %272 = vrot.lane.b32.xlu0 %v255_v30, %s813_s26  ;;  %v257_v32 = vrot.slane %v255_v30, 7  ;;  %v258_v33 = vrot.slane %v256_v31, 7  ;;  %v261_v34 = vrot.slane %v255_v30, 1  ;;  %v262_v35 = vrot.slane %v256_v31, 1  ;;  %669 = vmatpush3.bf16.msra.mxu0 %v740_v36 }
  0x25   : > { %v260_v37 = vsel %vm235_vm2, %v258_v33, %v257_v32  ;;  %v263_v38 = vsel %vm240_vm3, %v261_v34, %v262_v35  ;;  %v259_v39 = vsel %vm235_vm2, %v257_v32, %v258_v33  ;;  %v264_v40 = vsel %vm240_vm3, %v262_v35, %v261_v34  ;;  %685 = vmatpush3.bf16.msra.mxu1 %v746_v1 }
  0x26   : > { %v281_v41 = vsel %vm230_vm1, %v260_v37, %v263_v38  ;;  %v265_v42 = vsel %vm229_vm0, %v263_v38, %v260_v37  ;;  %v266_v43 = vsel %vm229_vm0, %v264_v40, %v259_v39  ;;  %v282_v44 = vsel %vm230_vm1, %v259_v39, %v264_v40 }
  0x27   : > { %285 = vrot.lane.b32.xlu1 %v281_v41, %s814_s7  ;;  %274 = vrot.lane.b32.xlu0 %v256_v31, %s813_s26  ;;  %268 = vst.msk [vmem:[#allocation2] sm:$0xff] %vm267_vm5, %v265_v42  ;;  %269 = vst.msk [vmem:[#allocation2 + $0x8] sm:$0xff] %vm267_vm5, %v266_v43 }
  0x2b   : > { %287 = vrot.lane.b32.xlu1 %v282_v44, %s814_s7 }
  0x95   : > { %v273_v45 = vpop.permute.xlu0 %272 }
  0x96   : > { %279 = vst.msk [vmem:[#allocation2] sm:$0xff] %vm278_vm6, %v273_v45 }
  0x99   : > { %v286_v46 = vpop.permute.xlu1 %285  ;;  %v275_v47 = vpop.permute.xlu0 %274 }
  0x9a   : > { %292 = vst.msk [vmem:[#allocation2] sm:$0xff] %vm291_vm7, %v286_v46 }
  0x9b   : > { %280 = vst.msk [vmem:[#allocation2 + $0x8] sm:$0xff] %vm278_vm6, %v275_v47 }
  0x9d   : > { %v288_v48 = vpop.permute.xlu1 %287 }
  0x9e   : > { %293 = vst.msk [vmem:[#allocation2 + $0x8] sm:$0xff] %vm291_vm7, %v288_v48 }
  0xa1   : > { %v294_v49 = vld [vmem:[#allocation2] sm:$0xff] }
  0xa5   : > { %v295_v50 = vld [vmem:[#allocation2 + $0x8] sm:$0xff] }
  0xa6   : > { %v296_v51 = vpack.c.bf16 %v295_v50, %v294_v49 }
  0xa8   : > { %671 = vmatmul.mubr.msk.bf16.vlgmr.msra.gmra.mrb[0].mxu0 %vm352_vm8, %v296_v51 }
 0x17b   : > { %v390_v57 = vpop.f32.mrb[0].mxu0 }
 0x17c   : > { %v391_v59 = vadd.f32 %v622_v56, %v390_v57  ;;  %v672_v60 = vpop.f32.mrb[1].mxu0 }
 0x17d   : > { %v393_v61 = vpop.f32.mrb[2].mxu0 }
 0x17e   : > { %v397_v62 = vmul.f32 0.1, %v391_v59  ;;  %v394_v63 = vadd.f32 %v622_v56, %v393_v61  ;;  %v673_v0 = vpop.f32.mrb[3].mxu0 }
 0x180   : > { %v399_v4 = vmax.f32 %v391_v59, %v397_v62  ;;  %v398_v5 = vmul.f32 0.1, %v394_v63 }
 0x182   : > { %v400_v6 = vmax.f32 %v394_v63, %v398_v5  ;;  %415 = vrot.lane.b32.xlu0 %v399_v4, %s813_s26  ;;  %v401_v7 = vrot.slane %v399_v4, 7  ;;  %v405_v8 = vrot.slane %v399_v4, 1 }
 0x184   : > { %v402_v9 = vrot.slane %v400_v6, 7  ;;  %v406_v10 = vrot.slane %v400_v6, 1  ;;  %417 = vrot.lane.b32.xlu1 %v400_v6, %s813_s26  ;;  %s216_s26 = sand.u32 1, %s801_s19  }
 0x185   : > { %s1043_s22 = scalar_lea.sflag [#allocation4], %s216_s26 }
 0x186   : > { %v404_v11 = vsel %vm235_vm2, %v402_v9, %v401_v7  ;;  %v407_v12 = vsel %vm240_vm3, %v405_v8, %v406_v10  ;;  %v403_v2 = vsel %vm235_vm2, %v401_v7, %v402_v9  ;;  %v408_v13 = vsel %vm240_vm3, %v406_v10, %v405_v8 }
 0x187   : > { %v423_v14 = vsel %vm230_vm1, %v404_v11, %v407_v12  ;;  %v409_v15 = vsel %vm229_vm0, %v407_v12, %v404_v11  ;;  %v424_v16 = vsel %vm230_vm1, %v403_v2, %v408_v13  ;;  %v410_v17 = vsel %vm229_vm0, %v408_v13, %v403_v2 }
 0x188   : > { %427 = vrot.lane.b32.xlu0 %v423_v14, %s814_s7  ;;  %411 = vst.msk [vmem:[#allocation2] sm:$0xff] %vm267_vm5, %v409_v15  ;;  %429 = vrot.lane.b32.xlu1 %v424_v16, %s814_s7  ;;  %412 = vst.msk [vmem:[#allocation2 + $0x8] sm:$0xff] %vm267_vm5, %v410_v17  ;;  %s619_s7 = sshll.u32 %s216_s26, 4 }
 0x189   : > { %s218_s10 = scalar_lea.vmem [#allocation3], %s619_s7 }
 0x18a   : > { %s553_s11 = sshll.u32 %s218_s10, 4  ;;  %s1034_s11 = int_to_ptr.vmem [resolvable:$true] %s553_s11 }
 0x18b   : > { %s747_s16 = scalar_lea.vmem %s1034_s11, 256  ;;  %p754_p0 = scmp.lt.s32.totalorder %s1034_s11, %s752_s23 }
 0x18c   : > { %p748_p11 = scmp.ne.s32.totalorder %s1034_s11, %s747_s16  ;;  %p755_p1 = scmp.lt.s32.totalorder %s753_s25, %s747_s16 }
 0x18e   : > { %p749_p12 = pnand %p748_p11, %p886_p5  ;;  %p756_p2 = por %p755_p1, %p754_p0 }
 0x190   : > { %p750_p13 = pneg %p749_p12 }
 0x192   : > { %p757_p3 = pnand %p756_p2, %p750_p13 }
 0x1f4   : > { %v416_v18 = vpop.permute.xlu0 %415 }
 0x1f5   : > { %421 = vst.msk [vmem:[#allocation2] sm:$0xff] %vm278_vm6, %v416_v18 }
 0x1f6   : > { %v418_v19 = vpop.permute.xlu1 %417 }
 0x1f7   : > { %422 = vst.msk [vmem:[#allocation2 + $0x8] sm:$0xff] %vm278_vm6, %v418_v19 }
 0x1fa   : > { %v428_v20 = vpop.permute.xlu0 %427  ;;  %v430_v21 = vpop.permute.xlu1 %429 }
 0x1fb   : > { %433 = vst.msk [vmem:[#allocation2] sm:$0xff] %vm291_vm7, %v428_v20  ;;  %434 = vst.msk [vmem:[#allocation2 + $0x8] sm:$0xff] %vm291_vm7, %v430_v21 }
 0x202   : > { %v435_v3 = vld [vmem:[#allocation2] sm:$0xff]  ;;  %v436_v22 = vld [vmem:[#allocation2 + $0x8] sm:$0xff] }
 0x203   : > { %v437_v23 = vpack.c.bf16 %v436_v22, %v435_v3 }
 0x205   : > { %687 = vmatmul.mubr.msk.bf16.vlgmr.msra.gmra.mrb[0].mxu1 %vm352_vm8, %v437_v23 }
 0x2d8   : > { %v530_v25 = vpop.f32.mrb[0].mxu1 }
 0x2d9   : > { %v531_v26 = vadd.f32 %v630_v24, %v530_v25  ;;  %v688_v27 = vpop.f32.mrb[1].mxu1 }
 0x2da   : > { %v533_v28 = vpop.f32.mrb[2].mxu1 }
 0x2db   : > { %537 = vst.msk [vmem:[%s218_s10] sm:$0xff] %vm267_vm5, %v531_v26  ;;  %v534_v29 = vadd.f32 %v630_v24, %v533_v28  ;;  %v689_v30 = vpop.f32.mrb[3].mxu1 }
 0x2dd   : > { %538 = vst.msk [vmem:[%s218_s10 + $0x8] sm:$0xff] %vm267_vm5, %v534_v29 }
 0x2de   : > { %760 = shalt.err (!%p757_p3)
}
 0x2df   : > { %s761_s30 = scalar_lea.hbm %s1039_s15, 256  ;;  %s765_s7 = scalar_lea.hbm %s1089_s5, 512 }
 0x2e0   : > { %p762_p4 = scmp.ne.s32.totalorder %s1039_s15, %s761_s30  ;;  %p766_p9 = scmp.lt.u32.totalorder %s1039_s15, %s1089_s5 }
 0x2e1   : > { %p767_p10 = scmp.lt.u32.totalorder %s765_s7, %s761_s30  ;;  %p769_p12 = scmp.lt.u32.totalorder %s761_s30, %s1039_s15 }
 0x2e2   : > { %p763_p7 = pnand %p762_p4, %p886_p5 }
 0x2e3   : > { %p768_p11 = por %p767_p10, %p766_p9 }
 0x2e4   : > { %p764_p8 = pneg %p763_p7 }
 0x2e5   : > { %p770_p13 = por %p769_p12, %p768_p11 }
 0x2e7   : > { %p771_p0 = pnand %p770_p13, %p764_p8 }
 0x2e9   : > { %774 = shalt.err (!%p771_p0)
}
 0x2ea   : > { %s816_s10 = smov 128   ;;  %s817_s12 = smov 8  }
 0x2eb   : > { %690 = dma.vmem_to_hbm [thread:$0]  (%p886_p5), %s1034_s11, 256, %s1039_s15, %s1043_s22, %s816_s10, %s816_s10, %s817_s12  }
 0x2ec PF: > { %p696_p1 = scmp.ge.s32.totalorder %s809_s21, 2  ;;  %s568_s13 = sand.u32 1, %s797_s18  }
 0x2ed   : > { %s569_s14 = scalar_lea.sflag [#allocation4], %s568_s13 }
 0x2ee   : > { %p693_p2 = pnand %p696_p1, %p890_p6 }
 0x2f0   : > { %792 = dma.done.wait (!%p693_p2), %s569_s14, 256  }
 0x2f1   : > { %794 = vsyncadd (!%p693_p2), %s569_s14, 4294967040  ;;  %p15_p3 = scmp.ge.s32.totalorder %s873_s24, 4   ;;  %s1092_s18 = smov %s801_s19 }
 0x2f2   : > { %s1093_s19 = smov %s805_s20  ;;  %s1094_s20 = smov %s884_s27 }
 0x2f3   : > { %s1095_s21 = smov %s873_s24  ;;  %17 = sbr.rel (!%p15_p3) target bundleno = 3 (0x3), region = 75 }
 0x2fa   :  { %574 = vsyncpa [#allocation4], 1 }
 0x2fb   :  { %576 = vsyncpa [#allocation4 + $0x1], 1 }

</bundles_post_ra>
